<compile_context>
chip_gen: v7x
topology: tpu7x:2x2x1
jax: 0.10.0
libtpu: 0.0.40
codegen_flags: <defaults>
</compile_context>

<pallas_src>
import functools

import numpy as np
import jax
import jax.numpy as jnp
from jax.experimental import pallas as pl
from jax.experimental.pallas import tpu as pltpu

MAX_DEPTH = 80.0


def _bilinear_matrix_np(in_size: int, out_size: int) -> np.ndarray:
    """Interpolation matrix M (out_size, in_size) reproducing PyTorch
    F.interpolate(..., mode='bilinear', align_corners=False) along one axis."""
    scale = in_size / out_size
    dst = np.arange(out_size, dtype=np.float64)
    src = (dst + 0.5) * scale - 0.5
    src = np.maximum(src, 0.0)                         # PyTorch clamps src at 0
    i0 = np.minimum(np.floor(src).astype(np.int64), in_size - 1)
    i1 = np.minimum(i0 + 1, in_size - 1)
    lam = (src - i0).astype(np.float32)
    m = np.zeros((out_size, in_size), np.float32)
    m[np.arange(out_size), i0] += 1.0 - lam
    m[np.arange(out_size), i1] += lam
    return m


@functools.lru_cache(maxsize=None)
def _static_tables(H: int, W: int):
    """Weight-independent structural constants, built once per (H, W) in numpy
    and cached on device (review item: hoist constant construction out of the
    per-call path)."""
    OH, OW = 3 * H, 3 * W
    j = np.arange(W)
    diff = j[:, None] - j[None, :]
    # band[t][j, k] == 1  iff  j - k == t - 1   (t = column tap index 0..2);
    # border rows simply have fewer taps -> horizontal zero padding folded in.
    band = np.stack([(diff == (t - 1)).astype(np.float32) for t in range(3)])
    u_h = _bilinear_matrix_np(H, OH)                   # (3H, H)
    u_wt = np.ascontiguousarray(_bilinear_matrix_np(W, OW).T)   # (W, 3W)
    return jnp.asarray(band), jnp.asarray(u_h), jnp.asarray(u_wt)


def _depth_head_kernel(x_ref, ccol_ref, b_ref, uh_ref, uwt_ref, o_ref):
    """Per-image DispHead: 3x3 conv (column pass as bf16 MXU band-matmuls, row
    pass as XLU sublane rolls + zero-padding masks) -> sigmoid -> separable
    bilinear x3 upsample (two f32 matmuls) -> * MAX_DEPTH.

    x_ref   : (H, W)     f32   one input image (batch/channel squeezed by BlockSpec)
    ccol_ref: (3, W, W)  bf16  banded column-conv matrices (conv taps folded in)
    b_ref   : (1,)       f32   conv bias (SMEM)
    uh_ref  : (3H, H)    f32   row-upsample matrix
    uwt_ref : (W, 3W)    f32   column-upsample matrix (transposed)
    o_ref   : (3H, 3W)   f32
    """
    H, W = x_ref.shape
    x = x_ref[...].astype(jnp.bfloat16)

    # Column pass: one bf16 MXU matmul per kernel row offset (f32 accumulate).
    col_m1 = jnp.dot(x, ccol_ref[0], preferred_element_type=jnp.float32)  # row offset -1
    col_0 = jnp.dot(x, ccol_ref[1], preferred_element_type=jnp.float32)   # row offset  0
    col_p1 = jnp.dot(x, ccol_ref[2], preferred_element_type=jnp.float32)  # row offset +1

    # Row pass: sublane rolls (XLU slot) + boundary masks = zero-padded shift.
    # One image per grid step, so the roll cannot wrap across batch boundaries.
    row = jax.lax.broadcasted_iota(jnp.int32, (H, W), 0)
    down = pltpu.roll(col_m1, shift=1, axis=0)         # out[i] = col_m1[i - 1]
    up_s = pltpu.roll(col_p1, shift=H - 1, axis=0)     # out[i] = col_p1[i + 1]
    conv = (col_0
            + jnp.where(row == 0, 0.0, down)
            + jnp.where(row == H - 1, 0.0, up_s))

    y = jax.nn.sigmoid(conv + b_ref[0])                # (H, W) f32

    # Separable bilinear x3 upsample (align_corners=False), kept in f32 to avoid
    # compounding bf16 rounding before the *80 scale (correctness review item).
    # Expand the larger spatial axis first (static choice; fewer MXU FLOPs).
    if H >= W:
        t = jnp.dot(uh_ref[...], y, preferred_element_type=jnp.float32)     # (3H, W)
        up = jnp.dot(t, uwt_ref[...], preferred_element_type=jnp.float32)   # (3H, 3W)
    else:
        t = jnp.dot(y, uwt_ref[...], preferred_element_type=jnp.float32)    # (H, 3W)
        up = jnp.dot(uh_ref[...], t, preferred_element_type=jnp.float32)    # (3H, 3W)

    o_ref[...] = up * MAX_DEPTH


def basic_network_forward(left, right, fea_ops, mat_ops, conv_w, conv_b):
    """left, right: (N, 1, H, W) float32.  Returns (N, 3H, 3W) float32."""
    # TODO(synk): AutoFeature / AutoMatching are not defined in the reference
    # source; they are treated as identity, so `right`, `fea_ops`, `mat_ops`
    # are unused (matching the provided forward, where `right` and the
    # cost-volume construction are commented out).
    del right, fea_ops, mat_ops

    N, C, H, W = left.shape
    assert C == 1, "DispHead(input_dim=1) expects a single-channel input"
    OH, OW = 3 * H, 3 * W

    band, u_h, u_wt = _static_tables(H, W)             # cached device constants

    # Fold the 3x3 taps into banded column-conv matrices (tiny per-call op,
    # since conv weights are parameters); bf16 feeds for the MXU.
    w = conv_w.reshape(3, 3).astype(jnp.float32)
    b = conv_b.reshape(1).astype(jnp.float32)
    ccol = jnp.tensordot(w, band, axes=[[1], [0]]).astype(jnp.bfloat16)   # (3, W, W)

    # Batch = parallel grid axis: one image per step (megacore on v7x), tiny
    # per-step VMEM working set (safe under v7x's 32 MiB scoped default).
    out = pl.pallas_call(
        _depth_head_kernel,
        out_shape=jax.ShapeDtypeStruct((N, OH, OW), jnp.float32),
        grid=(N,),
        in_specs=[
            pl.BlockSpec((None, None, H, W), lambda n: (n, 0, 0, 0)),   # x (per image)
            pl.BlockSpec((3, W, W), lambda n: (0, 0, 0)),               # ccol (shared)
            pl.BlockSpec(memory_space=pltpu.MemorySpace.SMEM),          # conv bias (1,)
            pl.BlockSpec((OH, H), lambda n: (0, 0)),                    # row-upsample
            pl.BlockSpec((W, OW), lambda n: (0, 0)),                    # col-upsample^T
        ],
        out_specs=pl.BlockSpec((None, OH, OW), lambda n: (n, 0, 0)),
        compiler_params=pltpu.CompilerParams(
            dimension_semantics=("parallel",)),
    )(left.astype(jnp.float32), ccol, b, u_h, u_wt)

    return out                                          # (N, 3H, 3W)


def _reference_forward(left, conv_w, conv_b):
    """Pure-JAX f32 reference of the effective forward (identity feature/matching)."""
    N, C, H, W = left.shape
    conv = jax.lax.conv_general_dilated(
        left.astype(jnp.float32), conv_w.astype(jnp.float32),
        window_strides=(1, 1), padding=((1, 1), (1, 1)),
        dimension_numbers=("NCHW", "OIHW", "NCHW"),
        precision=jax.lax.Precision.HIGHEST)
    y = jax.nn.sigmoid(conv + conv_b.reshape(1, 1, 1, 1))[:, 0]          # (N, H, W)
    u_h = jnp.asarray(_bilinear_matrix_np(H, 3 * H))
    u_w = jnp.asarray(_bilinear_matrix_np(W, 3 * W))
    up = jnp.einsum("ph,nhw,qw->npq", u_h, y, u_w,
                    precision=jax.lax.Precision.HIGHEST)
    return up * MAX_DEPTH


if __name__ == "__main__":
    key = jax.random.PRNGKey(0)
    k_l, k_r, k_w, k_b = jax.random.split(key, 4)

    N, C, H, W = 2, 1, 16, 16
    left = jax.random.normal(k_l, (N, C, H, W), dtype=jnp.float32)
    right = jax.random.normal(k_r, (N, C, H, W), dtype=jnp.float32)

    # Deterministic "init" of DispHead.conv1: Conv2d(1, 1, 3, padding=1)
    conv_w = jax.random.normal(k_w, (1, 1, 3, 3), dtype=jnp.float32) * 0.1
    conv_b = jax.random.normal(k_b, (1,), dtype=jnp.float32) * 0.1

    # fea_ops / mat_ops are NAS op selections for the (undefined) search cells.
    fea_ops = None
    mat_ops = None

    disp = basic_network_forward(left, right, fea_ops, mat_ops, conv_w, conv_b)
    disp = jax.block_until_ready(disp)

    assert disp.shape == (N, 3 * H, 3 * W)
    assert disp.dtype == jnp.float32

    # Numerical self-check against a pure-JAX f32 reference (catches shift /
    # layout bugs; tolerance covers the intentional bf16 conv feeds).
    ref = jax.block_until_ready(_reference_forward(left, conv_w, conv_b))
    max_err = float(jnp.max(jnp.abs(disp - ref)))
    assert max_err < 1.0, f"kernel deviates from reference: max abs err {max_err}"

    print("KERNEL_OK")
</pallas_src>

<mosaic_0001>
module attributes {stable_mosaic.version = 11 : i64} {
  func.func @_depth_head_kernel(%arg0: i32, %arg1: memref<1x1x16x16xf32, #tpu.memory_space<vmem>>, %arg2: memref<3x16x16xbf16, #tpu.memory_space<vmem>>, %arg3: memref<1xf32, #tpu.memory_space<smem>>, %arg4: memref<48x16xf32, #tpu.memory_space<vmem>>, %arg5: memref<16x48xf32, #tpu.memory_space<vmem>>, %arg6: memref<1x48x48xf32, #tpu.memory_space<vmem>>) attributes {dimension_semantics = [#tpu.dimension_semantics<parallel>], iteration_bounds = array<i64: 2>, scalar_prefetch = 0 : i64, scratch_operands = 0 : i64, tpu.core_type = #tpu.core_type<tc>, window_params = [{transform_indices = @transform_0, window_bounds = array<i64: 1, 1, 16, 16>}, {pipeline_mode = #tpu.pipeline_mode<synchronous>, transform_indices = @transform_1, window_bounds = array<i64: 3, 16, 16>}, {transform_indices = @transform_2, window_bounds = array<i64: 1>}, {pipeline_mode = #tpu.pipeline_mode<synchronous>, transform_indices = @transform_3, window_bounds = array<i64: 48, 16>}, {pipeline_mode = #tpu.pipeline_mode<synchronous>, transform_indices = @transform_4, window_bounds = array<i64: 16, 48>}, {transform_indices = @transform_5, window_bounds = array<i64: 1, 48, 48>}]} {
    %c0 = arith.constant 0 : index
    %c0_0 = arith.constant 0 : index
    %c0_1 = arith.constant 0 : index
    %c0_2 = arith.constant 0 : index
    %0 = vector.load %arg1[%c0, %c0_0, %c0_1, %c0_2] : memref<1x1x16x16xf32, #tpu.memory_space<vmem>>, vector<1x1x16x16xf32>
    %1 = vector.shape_cast %0 : vector<1x1x16x16xf32> to vector<16x16xf32>
    %2 = arith.truncf %1 : vector<16x16xf32> to vector<16x16xbf16>
    %c0_3 = arith.constant 0 : index
    %c0_4 = arith.constant 0 : index
    %c0_5 = arith.constant 0 : index
    %3 = vector.load %arg2[%c0_3, %c0_4, %c0_5] : memref<3x16x16xbf16, #tpu.memory_space<vmem>>, vector<1x16x16xbf16>
    %4 = vector.shape_cast %3 : vector<1x16x16xbf16> to vector<16x16xbf16>
    %cst = arith.constant dense<0.000000e+00> : vector<16x16xf32>
    %5 = tpu.matmul %2, %4, %cst {dimension_numbers = #tpu.dot_dimension_numbers<[1], [0], [0], [1], [0, 0, 1, 1], [], []>} : vector<16x16xbf16>, vector<16x16xbf16>, vector<16x16xf32> -> vector<16x16xf32>
    %c1 = arith.constant 1 : index
    %c0_6 = arith.constant 0 : index
    %c0_7 = arith.constant 0 : index
    %6 = vector.load %arg2[%c1, %c0_6, %c0_7] : memref<3x16x16xbf16, #tpu.memory_space<vmem>>, vector<1x16x16xbf16>
    %7 = vector.shape_cast %6 : vector<1x16x16xbf16> to vector<16x16xbf16>
    %cst_8 = arith.constant dense<0.000000e+00> : vector<16x16xf32>
    %8 = tpu.matmul %2, %7, %cst_8 {dimension_numbers = #tpu.dot_dimension_numbers<[1], [0], [0], [1], [0, 0, 1, 1], [], []>} : vector<16x16xbf16>, vector<16x16xbf16>, vector<16x16xf32> -> vector<16x16xf32>
    %c2 = arith.constant 2 : index
    %c0_9 = arith.constant 0 : index
    %c0_10 = arith.constant 0 : index
    %9 = vector.load %arg2[%c2, %c0_9, %c0_10] : memref<3x16x16xbf16, #tpu.memory_space<vmem>>, vector<1x16x16xbf16>
    %10 = vector.shape_cast %9 : vector<1x16x16xbf16> to vector<16x16xbf16>
    %cst_11 = arith.constant dense<0.000000e+00> : vector<16x16xf32>
    %11 = tpu.matmul %2, %10, %cst_11 {dimension_numbers = #tpu.dot_dimension_numbers<[1], [0], [0], [1], [0, 0, 1, 1], [], []>} : vector<16x16xbf16>, vector<16x16xbf16>, vector<16x16xf32> -> vector<16x16xf32>
    %12 = tpu.iota {dimensions = array<i32: 0>} : vector<16x16xi32>
    %c1_i32 = arith.constant 1 : i32
    %13 = tpu.dynamic_rotate %5 by %c1_i32 dim 0 : vector<16x16xf32>, i32 -> vector<16x16xf32>
    %c15_i32 = arith.constant 15 : i32
    %14 = tpu.dynamic_rotate %11 by %c15_i32 dim 0 : vector<16x16xf32>, i32 -> vector<16x16xf32>
    %c0_i32 = arith.constant 0 : i32
    %15 = vector.broadcast %c0_i32 : i32 to vector<16x16xi32>
    %16 = arith.cmpi eq, %12, %15 : vector<16x16xi32>
    %cst_12 = arith.constant 0.000000e+00 : f32
    %17 = vector.broadcast %cst_12 : f32 to vector<16x16xf32>
    %18 = arith.select %16, %17, %13 : vector<16x16xi1>, vector<16x16xf32>
    %19 = arith.addf %8, %18 : vector<16x16xf32>
    %c15_i32_13 = arith.constant 15 : i32
    %20 = vector.broadcast %c15_i32_13 : i32 to vector<16x16xi32>
    %21 = arith.cmpi eq, %12, %20 : vector<16x16xi32>
    %cst_14 = arith.constant 0.000000e+00 : f32
    %22 = vector.broadcast %cst_14 : f32 to vector<16x16xf32>
    %23 = arith.select %21, %22, %14 : vector<16x16xi1>, vector<16x16xf32>
    %24 = arith.addf %19, %23 : vector<16x16xf32>
    %c0_15 = arith.constant 0 : index
    %25 = memref.load %arg3[%c0_15] : memref<1xf32, #tpu.memory_space<smem>>
    %26 = vector.broadcast %25 : f32 to vector<16x16xf32>
    %27 = arith.addf %24, %26 : vector<16x16xf32>
    %28 = arith.negf %27 : vector<16x16xf32>
    %29 = math.exp %28 : vector<16x16xf32>
    %cst_16 = arith.constant 1.000000e+00 : f32
    %30 = vector.broadcast %cst_16 : f32 to vector<16x16xf32>
    %31 = arith.addf %30, %29 : vector<16x16xf32>
    %32 = arith.divf %30, %31 : vector<16x16xf32>
    %c0_17 = arith.constant 0 : index
    %c0_18 = arith.constant 0 : index
    %33 = vector.load %arg4[%c0_17, %c0_18] : memref<48x16xf32, #tpu.memory_space<vmem>>, vector<48x16xf32>
    %cst_19 = arith.constant dense<0.000000e+00> : vector<48x16xf32>
    %34 = tpu.matmul %33, %32, %cst_19 {dimension_numbers = #tpu.dot_dimension_numbers<[1], [0], [0], [1], [0, 0, 1, 1], [], []>} : vector<48x16xf32>, vector<16x16xf32>, vector<48x16xf32> -> vector<48x16xf32>
    %c0_20 = arith.constant 0 : index
    %c0_21 = arith.constant 0 : index
    %35 = vector.load %arg5[%c0_20, %c0_21] : memref<16x48xf32, #tpu.memory_space<vmem>>, vector<16x48xf32>
    %cst_22 = arith.constant dense<0.000000e+00> : vector<48x48xf32>
    %36 = tpu.matmul %34, %35, %cst_22 {dimension_numbers = #tpu.dot_dimension_numbers<[1], [0], [0], [1], [0, 0, 1, 1], [], []>} : vector<48x16xf32>, vector<16x48xf32>, vector<48x48xf32> -> vector<48x48xf32>
    %cst_23 = arith.constant 8.000000e+01 : f32
    %37 = vector.broadcast %cst_23 : f32 to vector<48x48xf32>
    %38 = arith.mulf %36, %37 : vector<48x48xf32>
    %c0_24 = arith.constant 0 : index
    %c0_25 = arith.constant 0 : index
    %c0_26 = arith.constant 0 : index
    %39 = vector.load %arg6[%c0_24, %c0_25, %c0_26] : memref<1x48x48xf32, #tpu.memory_space<vmem>>, vector<1x48x48xf32>
    %40 = vector.shape_cast %39 : vector<1x48x48xf32> to vector<48x48xf32>
    %41 = vector.shape_cast %38 : vector<48x48xf32> to vector<1x48x48xf32>
    tpu.vector_store %arg6[%c0_24, %c0_25, %c0_26], %41 {strides = array<i32>} : memref<1x48x48xf32, #tpu.memory_space<vmem>>, vector<1x48x48xf32>,
    return
  }
  func.func @transform_0(%arg0: i32) -> (i32, i32, i32, i32) {
    %c0_i32 = arith.constant 0 : i32
    %c0_i32_0 = arith.constant 0 : i32
    %c0_i32_1 = arith.constant 0 : i32
    %c0_i32_2 = arith.constant 0 : i32
    return %arg0, %c0_i32, %c0_i32_0, %c0_i32_1 : i32, i32, i32, i32
  }
  func.func @transform_1(%arg0: i32) -> (i32, i32, i32) {
    %c0_i32 = arith.constant 0 : i32
    %c0_i32_0 = arith.constant 0 : i32
    %c0_i32_1 = arith.constant 0 : i32
    %c0_i32_2 = arith.constant 0 : i32
    return %c0_i32, %c0_i32_0, %c0_i32_1 : i32, i32, i32
  }
  func.func @transform_2(%arg0: i32) -> i32 {
    %c0_i32 = arith.constant 0 : i32
    %c0_i32_0 = arith.constant 0 : i32
    return %c0_i32 : i32
  }
  func.func @transform_3(%arg0: i32) -> (i32, i32) {
    %c0_i32 = arith.constant 0 : i32
    %c0_i32_0 = arith.constant 0 : i32
    %c0_i32_1 = arith.constant 0 : i32
    return %c0_i32, %c0_i32_0 : i32, i32
  }
  func.func @transform_4(%arg0: i32) -> (i32, i32) {
    %c0_i32 = arith.constant 0 : i32
    %c0_i32_0 = arith.constant 0 : i32
    %c0_i32_1 = arith.constant 0 : i32
    return %c0_i32, %c0_i32_0 : i32, i32
  }
  func.func @transform_5(%arg0: i32) -> (i32, i32, i32) {
    %c0_i32 = arith.constant 0 : i32
    %c0_i32_0 = arith.constant 0 : i32
    %c0_i32_1 = arith.constant 0 : i32
    return %arg0, %c0_i32, %c0_i32_0 : i32, i32, i32
  }
}

</mosaic_0001>

<bundles_post_ra>
// kernel: tpu_custom_call.1
= control target key start
LH: loop header
LB: loop body
LE: loop exit
PB: predicated region body
PF: predicated region fallthrough
CT: control target
= control target key end

     0   :  { %s1171_s0 = inlined_call_operand.vmem [shape: f32[2,1,16,16], index: 0, kind: input, shape index: {}]   ;;  %s1172_s1 = inlined_call_operand.vmem [shape: bf16[3,16,16], index: 1, kind: input, shape index: {}]   ;;  %s1173_s2 = inlined_call_operand.<no memory space> [shape: f32[1], index: 2, kind: input, shape index: {}]   ;;  %s1174_s3 = inlined_call_operand.vmem [shape: f32[48,16], index: 3, kind: input, shape index: {}]   ;;  %s1175_s4 = inlined_call_operand.vmem [shape: f32[16,48], index: 4, kind: input, shape index: {}]   ;;  %s1176_s5 = inlined_call_operand.hbm [shape: f32[2,48,48], index: 5, kind: output, shape index: {}]  }
   0x1   :  { %10 = sst [smem:[#allocation2]] %s1173_s2 }
   0x2   :  { %11 = vsyncpa [#allocation4], 0 }
   0x3   :  { %13 = vsyncpa [#allocation4 + $0x1], 0  ;;  %s1011_s20 = smov 0   ;;  %s1013_s21 = smov 0  }
   0x4   :  { %s1015_s22 = smov 0   ;;  %s1017_s23 = smov 0  }
   0x5 LB: > { %s1032_s2 = sadd.s32 4294967295, %s971_s23   ;;  %s743_s24 = sadd.s32 4294967294, %s971_s23   ;;  %s971_s23 = sphi %s1017_s23, %s1182_s23   ;;  %s967_s22 = sphi %s1015_s22, %s1181_s22   ;;  %s963_s21 = sphi %s1013_s21, %s1180_s21   ;;  %s959_s20 = sphi %s1011_s20, %s1179_s20  }
   0x6   : > { %s1036_s25 = sadd.s32 1, %s971_s23   ;;  %s136_s26 = sadd.s32 1, %s967_s22 }
   0x7   : > { %s133_s27 = ssub.s32 %s971_s23, %s1036_s25  ;;  %p146_p0 = scmp.ne.s32.totalorder %s967_s22, %s963_s21 }
   0x8   : > { %p134_p1 = scmp.eq.s32.totalorder %s133_s27, 0  ;;  %p147_p2 = scmp.eq.s32.totalorder %s1032_s2, 1 }
   0x9   : > { %p152_p3 = scmp.ne.s32.totalorder %s963_s21, %s959_s20  ;;  %p153_p4 = scmp.eq.s32.totalorder %s743_s24, 1 }
   0xa   : > { %s1047_s28 = scalar_select %p134_p1, %s967_s22, %s136_s26  }
   0xb   : > { %p1049_p5 = por %p147_p2, %p146_p0  ;;  %p1053_p6 = por %p153_p4, %p152_p3 }
   0xc   : > { %p746_p7 = scmp.ge.s32.totalorder %s971_s23, 1  ;;  %p191_p8 = scmp.lt.s32.totalorder %s971_s23, 3 }
   0xe   : > { %p192_p9 = pnand %p746_p7, %p191_p8 }
   0xf   : > { %v898_v0 = vld [vmem:[%s1172_s1] sm:$0xff] (!%p192_p9)   ;;  %v973_v1 = vmov (!%p192_p9), 0.0   ;;  %p219_p10 = scmp.lt.s32.totalorder (!%p192_p9), %s1032_s2, 1  ;;  %v899_v2 = vld [vmem:[%s1172_s1 + $0x10] sm:$0xff] (!%p192_p9)   ;;  %vm974_vm0 = vmmov (!%p192_p9), 0   ;;  %vm236_vm1 = vcmask (!%p192_p9), 130048   ;;  %v334_v11 = vlaneseq (!%p192_p9) }
  0x10   : > { %195 = sbr.rel (%p192_p9) target bundleno = 742 (0x2e6), region = 40  ;;  %799 = vmatprep.subr.bf16.mxu0 (!%p192_p9), %v973_v1  ;;  %805 = vmatprep.subr.bf16.mxu1 (!%p192_p9), %v973_v1  ;;  %v900_v5 = vld [vmem:[%s1172_s1 + $0x8] sm:$0xff] (!%p192_p9)   ;;  %v420_v7 = vld [vmem:[%s1174_s3] sm:$0xff] (!%p192_p9)  ;;  %s404_s6 = sld [smem:[#allocation2]] (!%p192_p9)  ;;  %v422_v53 = vld [vmem:[%s1174_s3 + $0x10] sm:$0xff] (!%p192_p9)  ;;  %vm660_vm6 = vcmask (!%p192_p9), 392192  }
  0x11   : > { %800 = vmatpush3.bf16.msra.mxu0 (!%p192_p9), %v898_v0  ;;  %801 = vmatprep.mubr.msk.bf16.mxu0 (!%p192_p9), %vm974_vm0, %v973_v1  ;;  %v539_v8 = vld [vmem:[%s1175_s4] sm:$0xff] (!%p192_p9)  ;;  %v540_v9 = vld [vmem:[%s1175_s4 + $0x8] sm:$0xff] (!%p192_p9)  ;;  %v335_v12 = vshrl.u32 (!%p192_p9), %v334_v11, 7  ;;  %v423_v54 = vld [vmem:[%s1174_s3 + $0x18] sm:$0xff] (!%p192_p9)  ;;  %s216_s17 = sand.u32 (!%p192_p9), 1, %s963_s21   ;;  %s854_s24 = smul.u32 (!%p192_p9), 768, %s1032_s2 }
  0x12   : > { %806 = vmatpush3.bf16.msra.mxu1 (!%p192_p9), %v899_v2  ;;  %807 = vmatprep.mubr.msk.bf16.mxu1 (!%p192_p9), %vm974_vm0, %v973_v1  ;;  %v847_v10 = vpack.c.bf16 (!%p192_p9), %v540_v9, %v539_v8  ;;  %v421_v52 = vld [vmem:[%s1174_s3 + $0x8] sm:$0xff] (!%p192_p9)  ;;  %v424_v55 = vld [vmem:[%s1174_s3 + $0x20] sm:$0xff] (!%p192_p9)  ;;  %s853_s18 = smul.u32 (!%p192_p9), 48, %s216_s17  ;;  %s975_s9 = smov (!%p192_p9), [#allocation3]  }
  0x13   : > { %811 = vmatprep.subr.bf16.mxu0 (!%p192_p9), %v973_v1  ;;  %vm339_vm2 = vcmp.lt.s32.totalorder (!%p192_p9), %v335_v12, 1  ;;  %vm344_vm3 = vcmp.lt.s32.totalorder (!%p192_p9), %v335_v12, 7  ;;  %vm347_vm4 = vcmp.eq.s32.totalorder (!%p192_p9), %v335_v12, 0  ;;  %v336_v25 = vadd.s32 (!%p192_p9), 8, %v335_v12  ;;  %v425_v56 = vld [vmem:[%s1174_s3 + $0x28] sm:$0xff] (!%p192_p9)  ;;  %s1124_s7 = scalar_lea.hbm (!%p192_p9), %s1176_s5, %s854_s24 }
  0x14   : > { %s218_s19 = scalar_lea.vmem (!%p192_p9), [#allocation3], %s853_s18 }
  0x15   : > { %vm399_vm5 = vcmp.eq.s32.totalorder (!%p192_p9), %v336_v25, 15  ;;  %s681_s26 = sshll.u32 (!%p192_p9), %s218_s19, 4  ;;  %s1126_s26 = int_to_ptr.vmem [resolvable:$true] %s681_s26 }
  0x16   : > { %v405_v34 = vstv (!%p192_p9), %s404_s6  ;;  %s909_s8 = scalar_lea.vmem (!%p192_p9), %s1126_s26, 768 }
  0x17   : > { %s220_s10 = scalar_select %p219_p10, %s1032_s2, 1 }
  0x18   : > { %s1130_s2 = scalar_lea.sflag [#allocation4], %s216_s17  ;;  %p910_p11 = scmp.ne.s32.totalorder %s1126_s26, %s909_s8 }
  0x19   : > { %s776_s11 = sshll.u32 %s220_s10, 4  ;;  %s913_s10 = sshll.u32 %s975_s9, 4  ;;  %s914_s10 = int_to_ptr.vmem [resolvable:$false] %s913_s10 }
  0x1a   : > { %s223_s14 = scalar_lea.vmem %s1171_s0, %s776_s11  ;;  %p911_p12 = pnand %p910_p11, %p1049_p5 }
  0x1b   : > { %v225_v3 = vld [vmem:[%s223_s14] sm:$0xff]  ;;  %v226_v4 = vld [vmem:[%s223_s14 + $0x8] sm:$0xff]  ;;  %s915_s11 = scalar_lea.vmem %s914_s10, 1536  ;;  %p916_p0 = scmp.lt.s32.totalorder %s1126_s26, %s914_s10 }
  0x1c   : > { %v227_v6 = vpack.c.bf16 %v226_v4, %v225_v3  ;;  %p912_p13 = pneg %p911_p12  ;;  %p917_p1 = scmp.lt.s32.totalorder %s915_s11, %s909_s8 }
  0x1e   : > { %802 = vmatmul.mubr.msk.bf16.vlgmr.msra.gmra.mrb[0].mxu0 %vm236_vm1, %v227_v6  ;;  %808 = vmatmul.mubr.msk.bf16.vlgmr.msra.gmra.mrb[0].mxu1 %vm236_vm1, %v227_v6  ;;  %p918_p2 = por %p917_p1, %p916_p0 }
  0x1f   : > { %812 = vmatpush3.bf16.msra.mxu0 %v900_v5  ;;  %813 = vmatprep.mubr.msk.bf16.mxu0 %vm974_vm0, %v973_v1 }
  0x20   : > { %821 = vmatprep.mubr.msk.f32.mxu1 %vm236_vm1, %v420_v7  ;;  %848 = vmatprep.subr.bf16.mxu0 %v847_v10  ;;  %p919_p3 = pnand %p918_p2, %p912_p13 }
  0x26   : > { %814 = vmatmul.mubr.msk.bf16.vlgmr.msra.gmra.mrb[4].mxu0 %vm236_vm1, %v227_v6 }
  0x27   : > { %850 = vmatpush3.bf16.msra.mxu0 %v847_v10 }
  0xf1   : > { %v274_v13 = vpop.f32.mrb[0].mxu0  ;;  %v327_v14 = vpop.f32.mrb[0].mxu1 }
  0xf2   : > { %v803_v15 = vpop.f32.mrb[1].mxu0  ;;  %v342_v16 = vrot.slane %v327_v14, 1  ;;  %v809_v17 = vpop.f32.mrb[1].mxu1  ;;  %v337_v20 = vrot.slane %v274_v13, 7 }
  0xf3   : > { %v277_v18 = vpop.f32.mrb[2].mxu0  ;;  %v330_v19 = vpop.f32.mrb[2].mxu1 }
  0xf4   : > { %v338_v21 = vrot.slane %v277_v18, 7  ;;  %v804_v22 = vpop.f32.mrb[3].mxu0  ;;  %v343_v23 = vrot.slane %v330_v19, 1  ;;  %v810_v24 = vpop.f32.mrb[3].mxu1 }
  0xf6   : > { %v341_v26 = vsel %vm339_vm2, %v338_v21, %v337_v20  ;;  %v345_v27 = vsel %vm344_vm3, %v342_v16, %v343_v23  ;;  %v340_v28 = vsel %vm339_vm2, %v337_v20, %v338_v21  ;;  %v346_v29 = vsel %vm344_vm3, %v343_v23, %v342_v16 }
  0xf7   : > { %v349_v30 = vsel %vm347_vm4, 0.0, %v341_v26  ;;  %v401_v39 = vsel %vm399_vm5, 0.0, %v346_v29 }
  0xf9   : > { %v391_v31 = vpop.f32.mrb[4].mxu0 }
  0xfa   : > { %v392_v32 = vadd.f32 %v391_v31, %v349_v30  ;;  %v815_v33 = vpop.f32.mrb[5].mxu0 }
  0xfb   : > { %v394_v35 = vpop.f32.mrb[6].mxu0 }
  0xfc   : > { %v402_v36 = vadd.f32 %v392_v32, %v345_v27  ;;  %v395_v37 = vadd.f32 %v394_v35, %v340_v28  ;;  %v816_v38 = vpop.f32.mrb[7].mxu0 }
  0xfe   : > { %v406_v40 = vadd.f32 %v405_v34, %v402_v36  ;;  %v403_v41 = vadd.f32 %v401_v39, %v395_v37 }
 0x100   : > { %v759_v42 = vmul.f32 -1.442695, %v406_v40  ;;  %v407_v43 = vadd.f32 %v405_v34, %v403_v41 }
 0x102   : > { %901 = vpow2.f32 %v759_v42  ;;  %v760_v44 = vmul.f32 -1.442695, %v407_v43 }
 0x104   : > { %903 = vpow2.f32 %v760_v44 }
 0x10c   : > { %v902_v45 = vpop.eup %901 }
 0x10d   : > { %v414_v46 = vadd.f32 1.0, %v902_v45 }
 0x10e   : > { %v904_v47 = vpop.eup %903 }
 0x10f   : > { %v415_v48 = vadd.f32 1.0, %v904_v47  ;;  %905 = vrcp.f32 %v414_v46 }
 0x111   : > { %907 = vrcp.f32 %v415_v48 }
 0x119   : > { %v906_v49 = vpop.eup %905 }
 0x11b   : > { %v908_v50 = vpop.eup %907 }
 0x11c   : > { %v843_v51 = vpack.c.bf16 %v908_v50, %v906_v49 }
 0x11e   : > { %844 = vmatprep.subr.bf16.mxu1 %v843_v51 }
 0x11f   : > { %846 = vmatpush3.bf16.msra.mxu1 %v843_v51 }
 0x120   : > { %851 = vmatprep.subr.bf16.mxu1 %v847_v10 }
 0x122   : > { %822 = vmatmul.mubr.msk.f32.vlgmr.msra.gmra.mrb[4].mxu1 %vm236_vm1, %v421_v52 }
 0x123   : > { %824 = vmatprep.mubr.msk.f32.mxu1 %vm236_vm1, %v422_v53  ;;  %852 = vmatpush3.bf16.msra.mxu1 %v847_v10 }
 0x126   : > { %825 = vmatmul.mubr.msk.f32.gmra.mrb[6].mxu1 %vm236_vm1, %v423_v54 }
 0x127   : > { %827 = vmatprep.mubr.msk.f32.mxu1 %vm236_vm1, %v424_v55 }
 0x12a   : > { %828 = vmatmul.mubr.msk.f32.gmra.mrb[8].mxu1 %vm236_vm1, %v425_v56 }
 0x1f5   : > { %v823_v57 = vpop.f32.mrb[4].mxu1 }
 0x1f6   : > { %v510_v58 = vpop.f32.mrb[5].mxu1 }
 0x1f7   : > { %834 = vmatprep.mubr.msk.f32.mxu0 %vm236_vm1, %v510_v58 }
 0x1f8   : > { %835 = vmatmul.mubr.msk.f32.vlgmr.msra.gmra.mrb[8].mxu0 %vm236_vm1, %v823_v57 }
 0x1f9   : > { %v826_v59 = vpop.f32.mrb[6].mxu1 }
 0x1fa   : > { %v520_v60 = vpop.f32.mrb[7].mxu1 }
 0x1fb   : > { %837 = vmatprep.mubr.msk.f32.mxu0 %vm236_vm1, %v520_v60 }
 0x1fc   : > { %838 = vmatmul.mubr.msk.f32.gmra.mrb[10].mxu0 %vm236_vm1, %v826_v59 }
 0x1fd   : > { %v829_v61 = vpop.f32.mrb[8].mxu1 }
 0x1fe   : > { %v530_v62 = vpop.f32.mrb[9].mxu1 }
 0x1ff   : > { %840 = vmatprep.mubr.msk.f32.mxu1 %vm236_vm1, %v530_v62 }
 0x200   : > { %841 = vmatmul.mubr.msk.f32.vlgmr.msra.gmra.mrb[10].mxu1 %vm236_vm1, %v829_v61 }
 0x2cb   : > { %v836_v63 = vpop.f32.mrb[8].mxu0 }
 0x2cc   : > { %v655_v0 = vmul.f32 80.0, %v836_v63  ;;  %v625_v1 = vpop.f32.mrb[9].mxu0 }
 0x2cd   : > { %v654_v2 = vmul.f32 80.0, %v625_v1 }
 0x2ce   : > { %662 = vst.msk [vmem:[%s218_s19 + $0x8] sm:$0xff] %vm660_vm6, %v655_v0 }
 0x2cf   : > { %661 = vst.msk [vmem:[%s218_s19] sm:$0xff] %vm660_vm6, %v654_v2  ;;  %v839_v3 = vpop.f32.mrb[10].mxu0 }
 0x2d0   : > { %v657_v4 = vmul.f32 80.0, %v839_v3  ;;  %v635_v5 = vpop.f32.mrb[11].mxu0 }
 0x2d1   : > { %v656_v6 = vmul.f32 80.0, %v635_v5 }
 0x2d2   : > { %664 = vst.msk [vmem:[%s218_s19 + $0x18] sm:$0xff] %vm660_vm6, %v657_v4 }
 0x2d3   : > { %663 = vst.msk [vmem:[%s218_s19 + $0x10] sm:$0xff] %vm660_vm6, %v656_v6  ;;  %v842_v7 = vpop.f32.mrb[10].mxu1 }
 0x2d4   : > { %v659_v8 = vmul.f32 80.0, %v842_v7  ;;  %v645_v9 = vpop.f32.mrb[11].mxu1 }
 0x2d5   : > { %v658_v10 = vmul.f32 80.0, %v645_v9 }
 0x2d6   : > { %666 = vst.msk [vmem:[%s218_s19 + $0x28] sm:$0xff] %vm660_vm6, %v659_v8 }
 0x2d7   : > { %665 = vst.msk [vmem:[%s218_s19 + $0x20] sm:$0xff] %vm660_vm6, %v658_v10 }
 0x2d8   : > { %922 = shalt.err (!%p919_p3)
}
 0x2d9   : > { %s923_s12 = scalar_lea.hbm %s1124_s7, 768  ;;  %s927_s15 = scalar_lea.hbm %s1176_s5, 1536 }
 0x2da   : > { %p924_p4 = scmp.ne.s32.totalorder %s1124_s7, %s923_s12  ;;  %p928_p9 = scmp.lt.u32.totalorder %s1124_s7, %s1176_s5 }
 0x2db   : > { %p929_p10 = scmp.lt.u32.totalorder %s927_s15, %s923_s12  ;;  %p931_p12 = scmp.lt.u32.totalorder %s923_s12, %s1124_s7 }
 0x2dc   : > { %p925_p7 = pnand %p924_p4, %p1049_p5 }
 0x2dd   : > { %p930_p11 = por %p929_p10, %p928_p9 }
 0x2de   : > { %p926_p8 = pneg %p925_p7 }
 0x2df   : > { %p932_p13 = por %p931_p12, %p930_p11 }
 0x2e1   : > { %p933_p0 = pnand %p932_p13, %p926_p8 }
 0x2e3   : > { %936 = shalt.err (!%p933_p0)
}
 0x2e4   : > { %s976_s18 = smov 128   ;;  %s977_s19 = smov 8  }
 0x2e5   : > { %855 = dma.vmem_to_hbm [thread:$0]  (%p1049_p5), %s1126_s26, 768, %s1124_s7, %s1130_s2, %s976_s18, %s976_s18, %s977_s19  }
 0x2e6 PF: > { %p861_p1 = scmp.ge.s32.totalorder %s971_s23, 2  ;;  %s696_s24 = sand.u32 1, %s959_s20  }
 0x2e7   : > { %s697_s27 = scalar_lea.sflag [#allocation4], %s696_s24 }
 0x2e8   : > { %p858_p2 = pnand %p861_p1, %p1053_p6 }
 0x2ea   : > { %954 = dma.done.wait (!%p858_p2), %s697_s27, 768  }
 0x2eb   : > { %956 = vsyncadd (!%p858_p2), %s697_s27, 4294966528  ;;  %p16_p3 = scmp.ge.s32.totalorder %s1036_s25, 4   ;;  %s1179_s20 = smov %s963_s21 }
 0x2ec   : > { %s1180_s21 = smov %s967_s22  ;;  %s1181_s22 = smov %s1047_s28 }
 0x2ed   : > { %s1182_s23 = smov %s1036_s25  ;;  %18 = sbr.rel (!%p16_p3) target bundleno = 5 (0x5), region = 77 }
 0x2f4   :  { %702 = vsyncpa [#allocation4], 1 }
 0x2f5   :  { %704 = vsyncpa [#allocation4 + $0x1], 1 }

</bundles_post_ra>
